<compile_context>
chip_gen: v7x
topology: tpu7x:2x2x1
jax: 0.10.0
libtpu: 0.0.40
codegen_flags: <defaults>
</compile_context>

<pallas_src>
import jax
import jax.numpy as jnp
from jax.experimental import pallas as pl
from jax.experimental.pallas import tpu as pltpu


def _conv1x1_kernel(w_ref, b_ref, x_ref, o_ref):
    # w_ref: (C_out, C_in)           b_ref: (C_out, 1)
    # x_ref: (B_blk, C_in, tile_m)   o_ref: (B_blk, C_out, tile_m)
    acc = jnp.einsum(
        "oc,bcm->bom", w_ref[...], x_ref[...], preferred_element_type=jnp.float32
    )
    # bias (C_out, 1) broadcasts over (B_blk, C_out, tile_m).
    o_ref[...] = (acc + b_ref[...]).astype(o_ref.dtype)


def _round_down(x, m):
    return (x // m) * m


def _vmem_limit_bytes():
    """~75% of physical VMEM: 96 MiB on v5e/v6e (128 MiB), 48 MiB on v7x (64 MiB)."""
    try:
        phys = int(pltpu.get_tpu_info().vmem_capacity_bytes)
    except Exception:
        phys = 64 * 1024 * 1024  # conservative fallback (v7x per-core size)
    return max(16 * 1024 * 1024, (phys * 3) // 4)


def _select_tiling(n, c_in, c_out, hw, itemsize, stream_budget_bytes):
    """Pick (B_blk, tile_m) so the double-buffered streaming working set fits the
    VMEM budget, the spatial tile is lane-dense (multiple of 128 or the full H*W),
    and the grid has >= 2 programs whenever there is enough work to split."""
    bytes_per_lane_per_img = 2 * (c_in + c_out) * itemsize  # in + out, double-buffered
    max_lanes_total = max(128, stream_budget_bytes // bytes_per_lane_per_img)

    if hw <= max_lanes_total:
        # Whole image fits in one lane-dense tile: amortize the ~0.35us per-step
        # overhead by blocking several images per step, but keep >= 2 grid programs
        # so both v7x TensorCores get work.
        tile_m = hw
        b_budget = max(1, max_lanes_total // max(hw, 1))
        b_blk = min(n, b_budget)
        if b_blk == n and n > 1:
            b_blk = max(1, n // 2)
        if n == 1 and hw >= 256:
            # Single image, single tile: split spatially (>=128 lanes per tile).
            tile_m = max(128, _round_down(pl.cdiv(hw, 2), 128))
        return b_blk, tile_m

    # Large image: stream one image at a time with a budget-sized 128-multiple tile;
    # cdiv grid + masked ragged last tile keeps every step lane-dense except one.
    tile_m = max(128, _round_down(min(max_lanes_total, hw), 128))
    return 1, tile_m


def to_image_forward(x_nchw, weight, bias):
    """Equivalent of nn.Conv2d(C_in, C_out, kernel_size=1)(x).

    x_nchw: (N, C_in, H, W) float32
    weight: (C_out, C_in)   float32  (PyTorch weight (C_out, C_in, 1, 1), squeezed)
    bias:   (C_out,)        float32
    returns: (N, C_out, H, W) float32
    """
    N, C_in, H, W = x_nchw.shape
    C_out = weight.shape[0]
    HW = H * W
    itemsize = jnp.dtype(x_nchw.dtype).itemsize

    # Free reshapes only - no HBM transposes.
    x3d = x_nchw.reshape(N, C_in, HW)   # (N, C_in, H*W)
    w2d = weight.reshape(C_out, C_in)   # (C_out, C_in)
    b2d = bias.reshape(C_out, 1)        # broadcasts over the lane (H*W) axis

    vmem_limit = _vmem_limit_bytes()
    # Reserve room for the resident (double-buffered) weight/bias plus compiler
    # slack; the remainder is the streaming-tile budget.
    param_bytes = 2 * (C_out * C_in + C_out) * jnp.dtype(weight.dtype).itemsize
    stream_budget = max(1 << 20, vmem_limit - param_bytes - (2 << 20))

    b_blk, tile_m = _select_tiling(N, C_in, C_out, HW, itemsize, stream_budget)
    grid = (pl.cdiv(N, b_blk), pl.cdiv(HW, tile_m))

    # TODO(synk): for production-sized channel counts (C_out >= 256) add a C_out grid
    # axis (MXU-shaped 256 on v6e/v7x, 128 on v5e) and mark the then-large weight
    # block pipeline_mode=pl.Buffered(1); irrelevant at these channel counts.
    # TODO(synk): if the surrounding model tolerates it, use bf16 I/O (keep the f32
    # MXU accumulate) to halve HBM traffic for this bandwidth-bound op.

    cost = pl.CostEstimate(
        flops=2 * N * HW * C_in * C_out,
        transcendentals=0,
        bytes_accessed=4 * N * HW * (C_in + C_out) + 4 * C_out * (C_in + 1),
    )

    out3d = pl.pallas_call(
        _conv1x1_kernel,
        out_shape=jax.ShapeDtypeStruct((N, C_out, HW), x_nchw.dtype),
        grid=grid,
        in_specs=[
            # Weight and bias stay resident (constant block index across the grid).
            pl.BlockSpec((C_out, C_in), lambda b, m: (0, 0)),
            pl.BlockSpec((C_out, 1), lambda b, m: (0, 0)),
            # Input: block B_blk images per step, tile the spatial (lane) dim.
            pl.BlockSpec((b_blk, C_in, tile_m), lambda b, m: (b, 0, m)),
        ],
        out_specs=pl.BlockSpec((b_blk, C_out, tile_m), lambda b, m: (b, 0, m)),
        compiler_params=pltpu.CompilerParams(
            dimension_semantics=("parallel", "parallel"),
            vmem_limit_bytes=vmem_limit,
        ),
        cost_estimate=cost,
    )(w2d, b2d, x3d)

    return out3d.reshape(N, C_out, H, W)


if __name__ == "__main__":
    key = jax.random.PRNGKey(0)
    k_x, k_w, k_b = jax.random.split(key, 3)

    N, C_in, C_out, H, W = 2, 4, 8, 16, 16

    x = jax.random.normal(k_x, (N, C_in, H, W), dtype=jnp.float32)
    # Deterministic synthetic parameters (shapes match nn.Conv2d(C_in, C_out, 1)).
    weight = jax.random.normal(k_w, (C_out, C_in), dtype=jnp.float32) * 0.1
    bias = jax.random.normal(k_b, (C_out,), dtype=jnp.float32) * 0.1

    out = jax.block_until_ready(to_image_forward(x, weight, bias))

    # Reference check (plain JAX einsum = 1x1 conv semantics).
    ref = jnp.einsum("nchw,oc->nohw", x, weight) + bias[None, :, None, None]
    assert out.shape == (N, C_out, H, W)
    assert jnp.allclose(out, ref, atol=1e-5, rtol=1e-5)

    print("KERNEL_OK")
</pallas_src>

<mosaic_0001>
module attributes {stable_mosaic.version = 11 : i64} {
  func.func @_conv1x1_kernel(%arg0: i32, %arg1: i32, %arg2: memref<8x4xf32, #tpu.memory_space<vmem>>, %arg3: memref<8x1xf32, #tpu.memory_space<vmem>>, %arg4: memref<1x4x256xf32, #tpu.memory_space<vmem>>, %arg5: memref<1x8x256xf32, #tpu.memory_space<vmem>>) attributes {dimension_semantics = [#tpu.dimension_semantics<parallel>, #tpu.dimension_semantics<parallel>], iteration_bounds = array<i64: 2, 1>, scalar_prefetch = 0 : i64, scratch_operands = 0 : i64, tpu.core_type = #tpu.core_type<tc>, window_params = [{pipeline_mode = #tpu.pipeline_mode<synchronous>, transform_indices = @transform_0, window_bounds = array<i64: 8, 4>}, {pipeline_mode = #tpu.pipeline_mode<synchronous>, transform_indices = @transform_1, window_bounds = array<i64: 8, 1>}, {transform_indices = @transform_2, window_bounds = array<i64: 1, 4, 256>}, {transform_indices = @transform_3, window_bounds = array<i64: 1, 8, 256>}]} {
    %c0 = arith.constant 0 : index
    %c0_0 = arith.constant 0 : index
    %0 = vector.load %arg2[%c0, %c0_0] : memref<8x4xf32, #tpu.memory_space<vmem>>, vector<8x4xf32>
    %c0_1 = arith.constant 0 : index
    %c0_2 = arith.constant 0 : index
    %c0_3 = arith.constant 0 : index
    %1 = vector.load %arg4[%c0_1, %c0_2, %c0_3] : memref<1x4x256xf32, #tpu.memory_space<vmem>>, vector<1x4x256xf32>
    "tpu.trace_start"() <{level = 10 : i32, message = "oc,bcm->bom"}> : () -> ()
    %cst = arith.constant dense<0.000000e+00> : vector<1x256x8xf32>
    %2 = tpu.matmul %1, %0, %cst {dimension_numbers = #tpu.dot_dimension_numbers<[1], [1], [0, 2], [0], [0, 0, 0, 2, 1, 0], [], []>} : vector<1x4x256xf32>, vector<8x4xf32>, vector<1x256x8xf32> -> vector<1x256x8xf32>
    %3 = tpu.transpose %2, [0, 2, 1] : vector<1x256x8xf32> -> vector<1x8x256xf32>
    "tpu.trace_stop"() : () -> ()
    %c0_4 = arith.constant 0 : index
    %c0_5 = arith.constant 0 : index
    %4 = vector.load %arg3[%c0_4, %c0_5] : memref<8x1xf32, #tpu.memory_space<vmem>>, vector<8x1xf32>
    %5 = vector.shape_cast %4 : vector<8x1xf32> to vector<1x8x1xf32>
    %6 = vector.broadcast %5 : vector<1x8x1xf32> to vector<1x8x256xf32>
    %7 = arith.addf %3, %6 : vector<1x8x256xf32>
    %c0_6 = arith.constant 0 : index
    %c0_7 = arith.constant 0 : index
    %c0_8 = arith.constant 0 : index
    %8 = vector.load %arg5[%c0_6, %c0_7, %c0_8] : memref<1x8x256xf32, #tpu.memory_space<vmem>>, vector<1x8x256xf32>
    tpu.vector_store %arg5[%c0_6, %c0_7, %c0_8], %7 {strides = array<i32>} : memref<1x8x256xf32, #tpu.memory_space<vmem>>, vector<1x8x256xf32>,
    return
  }
  func.func @transform_0(%arg0: i32, %arg1: i32) -> (i32, i32) {
    %c0_i32 = arith.constant 0 : i32
    %c0_i32_0 = arith.constant 0 : i32
    %c0_i32_1 = arith.constant 0 : i32
    return %c0_i32, %c0_i32_0 : i32, i32
  }
  func.func @transform_1(%arg0: i32, %arg1: i32) -> (i32, i32) {
    %c0_i32 = arith.constant 0 : i32
    %c0_i32_0 = arith.constant 0 : i32
    %c0_i32_1 = arith.constant 0 : i32
    return %c0_i32, %c0_i32_0 : i32, i32
  }
  func.func @transform_2(%arg0: i32, %arg1: i32) -> (i32, i32, i32) {
    %c0_i32 = arith.constant 0 : i32
    %c0_i32_0 = arith.constant 0 : i32
    return %arg0, %c0_i32, %arg1 : i32, i32, i32
  }
  func.func @transform_3(%arg0: i32, %arg1: i32) -> (i32, i32, i32) {
    %c0_i32 = arith.constant 0 : i32
    %c0_i32_0 = arith.constant 0 : i32
    return %arg0, %c0_i32, %arg1 : i32, i32, i32
  }
}

</mosaic_0001>

<bundles_post_ra>
// kernel: tpu_custom_call.1
= control target key start
LH: loop header
LB: loop body
LE: loop exit
PB: predicated region body
PF: predicated region fallthrough
CT: control target
= control target key end

     0   :  { %8 = vsyncpa [#allocation3], 0  ;;  %s1210_s0 = inlined_call_operand.vmem [shape: f32[8,4], index: 0, kind: input, shape index: {}]   ;;  %s1211_s1 = inlined_call_operand.vmem [shape: f32[8,1], index: 1, kind: input, shape index: {}]   ;;  %s1212_s2 = inlined_call_operand.vmem [shape: f32[2,4,256], index: 2, kind: input, shape index: {}]   ;;  %s1213_s3 = inlined_call_operand.hbm [shape: f32[2,8,256], index: 3, kind: output, shape index: {}]  }
   0x1   :  { %10 = vsyncpa [#allocation3 + $0x1], 0  ;;  %s1056_s12 = smov 0   ;;  %s1058_s13 = smov 0  }
   0x2   :  { %s1060_s14 = smov 0   ;;  %s1062_s15 = smov 0  }
   0x3   :  { %s1064_s16 = smov 0   ;;  %s1066_s17 = smov 0  }
   0x4 LB: > { %s761_s18 = sadd.s32 4294967295, %s1032_s17   ;;  %s762_s19 = sadd.s32 4294967294, %s1032_s17   ;;  %s1032_s17 = sphi %s1066_s17, %s16_s17   ;;  %s1028_s16 = sphi %s1064_s16, %s1220_s16   ;;  %s1024_s15 = sphi %s1062_s15, %s1219_s15   ;;  %s1020_s14 = sphi %s1060_s14, %s1218_s14   ;;  %s1016_s13 = sphi %s1058_s13, %s1217_s13   ;;  %s1012_s12 = sphi %s1056_s12, %s1216_s12  }
   0x5   : > { %s28_s20 = sadd.s32 1, %s1028_s16  ;;  %s107_s21 = sadd.s32 1, %s1020_s14 }
   0x6   : > { %p30_p0 = scmp.ge.s32.totalorder %s28_s20, 2  ;;  %p117_p1 = scmp.ne.s32.totalorder %s1020_s14, %s1016_s13 }
   0x7   : > { %p118_p2 = scmp.eq.s32.totalorder %s761_s18, 1  ;;  %p123_p3 = scmp.ne.s32.totalorder %s1016_s13, %s1012_s12 }
   0x8   : > { %s1222_s20 = smov (%p30_p0, %s28_s20), 0  ;;  %p124_p5 = scmp.eq.s32.totalorder %s762_s19, 1 }
   0x9   : > { %p1096_p4 = por %p118_p2, %p117_p1  ;;  %s102_s23 = ssub.s32 %s1028_s16, %s1222_s20 }
   0xa   : > { %p765_p6 = scmp.ge.s32.totalorder %s1032_s17, 1  ;;  %p105_p7 = scmp.eq.s32.totalorder %s102_s23, 0 }
   0xb   : > { %p1103_p8 = por %p124_p5, %p123_p3  ;;  %p161_p9 = scmp.lt.s32.totalorder %s1032_s17, 3 }
   0xc   : > { %s1109_s25 = scalar_select %p105_p7, %s1020_s14, %s107_s21  }
   0xd   : > { %p162_p10 = pnand %p765_p6, %p161_p9 }
   0xe   : > { %p190_p11 = scmp.lt.s32.totalorder (!%p162_p10), %s1024_s15, 1  ;;  %v200_v1 = vld [vmem:[%s1210_s0] sm:$0xff] (!%p162_p10)  ;;  %vm269_vm0 = vcmask (!%p162_p10), 31744   ;;  %v1034_v60 = vmov (!%p162_p10), 0   ;;  %s186_s8 = sand.u32 (!%p162_p10), 1, %s1016_s13  }
   0xf   : > { %165 = sbr.rel (%p162_p10) target bundleno = 608 (0x260), region = 32  ;;  %842 = vmatprep.subr.msk.mxu0 (!%p162_p10), %vm269_vm0, %v200_v1  ;;  %892 = vmatprep.subr.msk.mxu1 (!%p162_p10), %vm269_vm0, %v200_v1  ;;  %v658_v59 = vld [vmem:[%s1211_s1] sm:$0xff] (!%p162_p10)  ;;  %s766_s9 = sshll.u32 (!%p162_p10), %s186_s8, 4 }
  0x10   : > { %843 = vmatpush3.xpose.msk.msra.mxu0 (!%p162_p10), %vm269_vm0, %v200_v1  ;;  %893 = vmatpush3.xpose.msk.msra.mxu1 (!%p162_p10), %vm269_vm0, %v200_v1  ;;  %s808_s10 = sshll.u32 (!%p162_p10), %s1024_s15, 8  ;;  %s188_s11 = scalar_lea.vmem (!%p162_p10), [#allocation2], %s766_s9 }
  0x11   : > { %s685_s18 = sshll.u32 (!%p162_p10), %s188_s11, 4  ;;  %s1163_s23 = scalar_lea.hbm (!%p162_p10), %s1213_s3, %s808_s10  ;;  %s1165_s18 = int_to_ptr.vmem [resolvable:$true] %s685_s18 }
  0x16   : > { %s191_s26 = scalar_select %p190_p11, %s1024_s15, 1 }
  0x17   : > { %s1035_s15 = smov [#allocation2]  }
  0x18   : > { %s807_s27 = sshll.u32 %s191_s26, 3  ;;  %s669_s26 = scalar_lea.sflag [#allocation3], %s186_s8 }
  0x19   : > { %s197_s30 = scalar_lea.vmem %s1212_s2, %s807_s27  ;;  %s954_s27 = scalar_lea.vmem %s1165_s18, 256 }
  0x1a   : > { %v201_v0 = vld [vmem:[%s197_s30] sm:$0xff]  ;;  %p955_p12 = scmp.ne.s32.totalorder %s1165_s18, %s954_s27  ;;  %s958_s28 = sshll.u32 %s1035_s15, 4  ;;  %s959_s28 = int_to_ptr.vmem [resolvable:$false] %s958_s28 }
  0x1b   : > { %205 = vxpose.xlu0.b32.start.end [1/1] (short) %v201_v0, 128  ;;  %v203_v2 = vcombine.high %v201_v0, %v201_v0  ;;  %s960_s29 = scalar_lea.vmem %s959_s28, 512  ;;  %p961_p1 = scmp.lt.s32.totalorder %s1165_s18, %s959_s28 }
  0x1c   : > { %p956_p13 = pnand %p955_p12, %p1096_p4  ;;  %p962_p2 = scmp.lt.s32.totalorder %s960_s29, %s954_s27 }
  0x1e   : > { %p957_p0 = pneg %p956_p13  ;;  %p963_p3 = por %p962_p2, %p961_p1 }
  0x20   : > { %p964_p5 = pnand %p963_p3, %p957_p0 }
  0x58   : > { %237 = vxpose.xlu0.b32.start.end [1/1] (short) %v203_v2, 128 }
  0x9b   : > { %v221_v3 = vpop.trf.xlu0 }
  0x9c   : > { %844 = vmatprep.mubr.msk.f32.mxu0 %vm269_vm0, %v221_v3 }
  0x9f   : > { %v222_v4 = vpop.trf.xlu0 }
  0xa0   : > { %845 = vmatmul.mubr.msk.f32.vlgmr.msra.gmra.mrb[0].mxu0 %vm269_vm0, %v222_v4 }
  0xa3   : > { %v223_v5 = vpop.trf.xlu0 }
  0xa4   : > { %847 = vmatprep.mubr.msk.f32.mxu0 %vm269_vm0, %v223_v5 }
  0xa7   : > { %v224_v6 = vpop.trf.xlu0 }
  0xa8   : > { %848 = vmatmul.mubr.msk.f32.gmra.mrb[2].mxu0 %vm269_vm0, %v224_v6 }
  0xab   : > { %v225_v7 = vpop.trf.xlu0 }
  0xac   : > { %850 = vmatprep.mubr.msk.f32.mxu0 %vm269_vm0, %v225_v7 }
  0xaf   : > { %v226_v8 = vpop.trf.xlu0 }
  0xb0   : > { %851 = vmatmul.mubr.msk.f32.gmra.mrb[4].mxu0 %vm269_vm0, %v226_v8 }
  0xb3   : > { %v227_v9 = vpop.trf.xlu0 }
  0xb4   : > { %853 = vmatprep.mubr.msk.f32.mxu0 %vm269_vm0, %v227_v9 }
  0xb7   : > { %v228_v10 = vpop.trf.xlu0 }
  0xb8   : > { %854 = vmatmul.mubr.msk.f32.gmra.mrb[6].mxu0 %vm269_vm0, %v228_v10 }
  0xbb   : > { %v229_v11 = vpop.trf.xlu0 }
  0xbc   : > { %856 = vmatprep.mubr.msk.f32.mxu0 %vm269_vm0, %v229_v11 }
  0xbf   : > { %v230_v12 = vpop.trf.xlu0 }
  0xc0   : > { %857 = vmatmul.mubr.msk.f32.gmra.mrb[8].mxu0 %vm269_vm0, %v230_v12 }
  0xc3   : > { %v231_v13 = vpop.trf.xlu0 }
  0xc4   : > { %859 = vmatprep.mubr.msk.f32.mxu0 %vm269_vm0, %v231_v13 }
  0xc7   : > { %v232_v14 = vpop.trf.xlu0 }
  0xc8   : > { %860 = vmatmul.mubr.msk.f32.gmra.mrb[10].mxu0 %vm269_vm0, %v232_v14 }
  0xcb   : > { %v233_v15 = vpop.trf.xlu0 }
  0xcc   : > { %862 = vmatprep.mubr.msk.f32.mxu0 %vm269_vm0, %v233_v15 }
  0xcf   : > { %v234_v16 = vpop.trf.xlu0 }
  0xd0   : > { %863 = vmatmul.mubr.msk.f32.gmra.mrb[12].mxu0 %vm269_vm0, %v234_v16 }
  0xd3   : > { %v235_v17 = vpop.trf.xlu0 }
  0xd4   : > { %865 = vmatprep.mubr.msk.f32.mxu0 %vm269_vm0, %v235_v17 }
  0xd7   : > { %v236_v18 = vpop.trf.xlu0 }
  0xd8   : > { %866 = vmatmul.mubr.msk.f32.gmra.mrb[14].mxu0 %vm269_vm0, %v236_v18 }
  0xdb   : > { %v253_v19 = vpop.trf.xlu0 }
  0xdc   : > { %868 = vmatprep.mubr.msk.f32.mxu1 %vm269_vm0, %v253_v19 }
  0xdf   : > { %v254_v20 = vpop.trf.xlu0 }
  0xe0   : > { %869 = vmatmul.mubr.msk.f32.vlgmr.msra.gmra.mrb[0].mxu1 %vm269_vm0, %v254_v20 }
  0xe3   : > { %v255_v21 = vpop.trf.xlu0 }
  0xe4   : > { %871 = vmatprep.mubr.msk.f32.mxu1 %vm269_vm0, %v255_v21 }
  0xe7   : > { %v256_v22 = vpop.trf.xlu0 }
  0xe8   : > { %872 = vmatmul.mubr.msk.f32.gmra.mrb[2].mxu1 %vm269_vm0, %v256_v22 }
  0xeb   : > { %v257_v23 = vpop.trf.xlu0 }
  0xec   : > { %874 = vmatprep.mubr.msk.f32.mxu1 %vm269_vm0, %v257_v23 }
  0xef   : > { %v258_v24 = vpop.trf.xlu0 }
  0xf0   : > { %875 = vmatmul.mubr.msk.f32.gmra.mrb[4].mxu1 %vm269_vm0, %v258_v24 }
  0xf3   : > { %v259_v25 = vpop.trf.xlu0 }
  0xf4   : > { %877 = vmatprep.mubr.msk.f32.mxu1 %vm269_vm0, %v259_v25 }
  0xf7   : > { %v260_v26 = vpop.trf.xlu0 }
  0xf8   : > { %878 = vmatmul.mubr.msk.f32.gmra.mrb[6].mxu1 %vm269_vm0, %v260_v26 }
  0xfb   : > { %v261_v27 = vpop.trf.xlu0 }
  0xfc   : > { %880 = vmatprep.mubr.msk.f32.mxu1 %vm269_vm0, %v261_v27 }
  0xff   : > { %v262_v28 = vpop.trf.xlu0 }
 0x100   : > { %881 = vmatmul.mubr.msk.f32.gmra.mrb[8].mxu1 %vm269_vm0, %v262_v28 }
 0x103   : > { %v263_v29 = vpop.trf.xlu0 }
 0x104   : > { %883 = vmatprep.mubr.msk.f32.mxu1 %vm269_vm0, %v263_v29 }
 0x107   : > { %v264_v30 = vpop.trf.xlu0 }
 0x108   : > { %884 = vmatmul.mubr.msk.f32.gmra.mrb[10].mxu1 %vm269_vm0, %v264_v30 }
 0x10b   : > { %v265_v31 = vpop.trf.xlu0 }
 0x10c   : > { %886 = vmatprep.mubr.msk.f32.mxu1 %vm269_vm0, %v265_v31 }
 0x10f   : > { %v266_v32 = vpop.trf.xlu0 }
 0x110   : > { %887 = vmatmul.mubr.msk.f32.gmra.mrb[12].mxu1 %vm269_vm0, %v266_v32 }
 0x113   : > { %v267_v33 = vpop.trf.xlu0 }
 0x114   : > { %889 = vmatprep.mubr.msk.f32.mxu1 %vm269_vm0, %v267_v33 }
 0x117   : > { %v268_v34 = vpop.trf.xlu0 }
 0x118   : > { %890 = vmatmul.mubr.msk.f32.gmra.mrb[14].mxu1 %vm269_vm0, %v268_v34 }
 0x173   : > { %v846_v35 = vpop.f32.mrb[0].mxu0 }
 0x174   : > { %v435_v36 = vpop.f32.mrb[1].mxu0 }
 0x175   : > { %594 = vxpose.xlu1.b32.start [1/16] (narrow) %v435_v36, 8 }
 0x179   : > { %595 = vxpose.xlu1.b32.cont [2/16] (narrow) %v846_v35, 8 }
 0x17b   : > { %v849_v37 = vpop.f32.mrb[2].mxu0 }
 0x17c   : > { %v445_v38 = vpop.f32.mrb[3].mxu0 }
 0x17d   : > { %596 = vxpose.xlu1.b32.cont [3/16] (narrow) %v445_v38, 8 }
 0x181   : > { %597 = vxpose.xlu1.b32.cont [4/16] (narrow) %v849_v37, 8 }
 0x183   : > { %v852_v39 = vpop.f32.mrb[4].mxu0 }
 0x184   : > { %v455_v40 = vpop.f32.mrb[5].mxu0 }
 0x185   : > { %598 = vxpose.xlu1.b32.cont [5/16] (narrow) %v455_v40, 8 }
 0x189   : > { %599 = vxpose.xlu1.b32.cont [6/16] (narrow) %v852_v39, 8 }
 0x18b   : > { %v855_v41 = vpop.f32.mrb[6].mxu0 }
 0x18c   : > { %v465_v42 = vpop.f32.mrb[7].mxu0 }
 0x18d   : > { %600 = vxpose.xlu1.b32.cont [7/16] (narrow) %v465_v42, 8 }
 0x191   : > { %601 = vxpose.xlu1.b32.cont [8/16] (narrow) %v855_v41, 8 }
 0x193   : > { %v858_v43 = vpop.f32.mrb[8].mxu0 }
 0x194   : > { %v475_v44 = vpop.f32.mrb[9].mxu0 }
 0x195   : > { %602 = vxpose.xlu1.b32.cont [9/16] (narrow) %v475_v44, 8 }
 0x199   : > { %603 = vxpose.xlu1.b32.cont [10/16] (narrow) %v858_v43, 8 }
 0x19b   : > { %v861_v45 = vpop.f32.mrb[10].mxu0 }
 0x19c   : > { %v485_v46 = vpop.f32.mrb[11].mxu0 }
 0x19d   : > { %604 = vxpose.xlu1.b32.cont [11/16] (narrow) %v485_v46, 8 }
 0x1a1   : > { %605 = vxpose.xlu1.b32.cont [12/16] (narrow) %v861_v45, 8 }
 0x1a3   : > { %v864_v47 = vpop.f32.mrb[12].mxu0 }
 0x1a4   : > { %v495_v48 = vpop.f32.mrb[13].mxu0 }
 0x1a5   : > { %606 = vxpose.xlu1.b32.cont [13/16] (narrow) %v495_v48, 8 }
 0x1a9   : > { %607 = vxpose.xlu1.b32.cont [14/16] (narrow) %v864_v47, 8 }
 0x1ab   : > { %v867_v49 = vpop.f32.mrb[14].mxu0 }
 0x1ac   : > { %v505_v50 = vpop.f32.mrb[15].mxu0 }
 0x1ad   : > { %608 = vxpose.xlu1.b32.cont [15/16] (narrow) %v505_v50, 8 }
 0x1b1   : > { %609 = vxpose.xlu1.b32.end [16/16] (narrow) %v867_v49, 8 }
 0x1b3   : > { %v870_v51 = vpop.f32.mrb[0].mxu1 }
 0x1b4   : > { %v515_v52 = vpop.f32.mrb[1].mxu1 }
 0x1b5   : > { %626 = vxpose.xlu0.b32.start [1/16] (narrow) %v515_v52, 8 }
 0x1b9   : > { %627 = vxpose.xlu0.b32.cont [2/16] (narrow) %v870_v51, 8 }
 0x1bb   : > { %v873_v53 = vpop.f32.mrb[2].mxu1 }
 0x1bc   : > { %v525_v54 = vpop.f32.mrb[3].mxu1 }
 0x1bd   : > { %628 = vxpose.xlu0.b32.cont [3/16] (narrow) %v525_v54, 8 }
 0x1c1   : > { %629 = vxpose.xlu0.b32.cont [4/16] (narrow) %v873_v53, 8 }
 0x1c3   : > { %v876_v55 = vpop.f32.mrb[4].mxu1 }
 0x1c4   : > { %v535_v56 = vpop.f32.mrb[5].mxu1 }
 0x1c5   : > { %630 = vxpose.xlu0.b32.cont [5/16] (narrow) %v535_v56, 8 }
 0x1c9   : > { %631 = vxpose.xlu0.b32.cont [6/16] (narrow) %v876_v55, 8 }
 0x1cb   : > { %v879_v57 = vpop.f32.mrb[6].mxu1 }
 0x1cc   : > { %v545_v58 = vpop.f32.mrb[7].mxu1 }
 0x1cd   : > { %632 = vxpose.xlu0.b32.cont [7/16] (narrow) %v545_v58, 8 }
 0x1cf   : > { %951 = vset.pattern.permute.xlu1 %v1034_v60 }
 0x1d0   : > { %661 = vperm.xlu1 %951, %v658_v59  }
 0x1d1   : > { %633 = vxpose.xlu0.b32.cont [8/16] (narrow) %v879_v57, 8 }
 0x1d3   : > { %v882_v61 = vpop.f32.mrb[8].mxu1 }
 0x1d4   : > { %v555_v62 = vpop.f32.mrb[9].mxu1 }
 0x1d5   : > { %634 = vxpose.xlu0.b32.cont [9/16] (narrow) %v555_v62, 8 }
 0x1d9   : > { %635 = vxpose.xlu0.b32.cont [10/16] (narrow) %v882_v61, 8 }
 0x1db   : > { %v885_v63 = vpop.f32.mrb[10].mxu1 }
 0x1dc   : > { %v565_v0 = vpop.f32.mrb[11].mxu1 }
 0x1dd   : > { %636 = vxpose.xlu0.b32.cont [11/16] (narrow) %v565_v0, 8 }
 0x1e1   : > { %637 = vxpose.xlu0.b32.cont [12/16] (narrow) %v885_v63, 8 }
 0x1e3   : > { %v888_v1 = vpop.f32.mrb[12].mxu1 }
 0x1e4   : > { %v575_v2 = vpop.f32.mrb[13].mxu1 }
 0x1e5   : > { %638 = vxpose.xlu0.b32.cont [13/16] (narrow) %v575_v2, 8 }
 0x1e9   : > { %639 = vxpose.xlu0.b32.cont [14/16] (narrow) %v888_v1, 8 }
 0x1eb   : > { %v891_v3 = vpop.f32.mrb[14].mxu1 }
 0x1ec   : > { %v585_v4 = vpop.f32.mrb[15].mxu1 }
 0x1ed   : > { %640 = vxpose.xlu0.b32.cont [15/16] (narrow) %v585_v4, 8 }
 0x1f1   : > { %641 = vxpose.xlu0.b32.end [16/16] (narrow) %v891_v3, 8 }
 0x1f5   : > { %v610_v5 = vpop.trf.xlu1 }
 0x21a   : > { %952 = vset.pattern.permute.xlu0 %v1034_v60 }
 0x235   : > { %v642_v6 = vpop.trf.xlu0 }
 0x24f   : > { %v662_v7 = vpop.permute.xlu1 %661 }
 0x250   : > { %v664_v8 = vadd.f32 %v662_v7, %v610_v5  ;;  %v665_v9 = vadd.f32 %v662_v7, %v642_v6 }
 0x252   : > { %666 = vst [vmem:[%s188_s11] sm:$0xff] %v664_v8  ;;  %667 = vst [vmem:[%s188_s11 + $0x8] sm:$0xff] %v665_v9 }
 0x253   : > { %967 = shalt.err (!%p964_p5)
}
 0x254   : > { %s968_s30 = scalar_lea.hbm %s1163_s23, 256  ;;  %s972_s6 = scalar_lea.hbm %s1213_s3, 512 }
 0x255   : > { %p969_p6 = scmp.ne.s32.totalorder %s1163_s23, %s968_s30  ;;  %p973_p10 = scmp.lt.u32.totalorder %s1163_s23, %s1213_s3 }
 0x256   : > { %p974_p11 = scmp.lt.u32.totalorder %s972_s6, %s968_s30  ;;  %p976_p13 = scmp.lt.u32.totalorder %s968_s30, %s1163_s23 }
 0x257   : > { %p970_p7 = pnand %p969_p6, %p1096_p4 }
 0x258   : > { %p975_p12 = por %p974_p11, %p973_p10 }
 0x259   : > { %p971_p9 = pneg %p970_p7 }
 0x25a   : > { %p977_p0 = por %p976_p13, %p975_p12 }
 0x25c   : > { %p978_p1 = pnand %p977_p0, %p971_p9 }
 0x25e   : > { %981 = shalt.err (!%p978_p1)
}
 0x25f   : > { %894 = dma.vmem_to_hbm [thread:$0]  (%p1096_p4), %s1165_s18, 256, %s1163_s23, %s669_s26  }
 0x260 PF: > { %p900_p2 = scmp.ge.s32.totalorder %s1032_s17, 2  ;;  %s697_s9 = sand.u32 1, %s1012_s12  }
 0x261   : > { %s698_s10 = scalar_lea.sflag [#allocation3], %s697_s9 }
 0x262   : > { %p897_p3 = pnand %p900_p2, %p1103_p8 }
 0x264   : > { %1007 = dma.done.wait (!%p897_p3), %s698_s10, 256  }
 0x265   : > { %1009 = vsyncadd (!%p897_p3), %s698_s10, 4294967040  ;;  %s16_s17 = sadd.s32 1, %s1032_s17   ;;  %s1216_s12 = smov %s1016_s13 }
 0x266   : > { %p13_p5 = scmp.ge.s32.totalorder %s16_s17, 4   ;;  %s1217_s13 = smov %s1020_s14 }
 0x267   : > { %s1218_s14 = smov %s1109_s25  ;;  %s1219_s15 = smov %s1028_s16 }
 0x268   : > { %s1220_s16 = smov %s1222_s20  ;;  %15 = sbr.rel (!%p13_p5) target bundleno = 4 (0x4), region = 67 }
 0x26f   :  { %703 = vsyncpa [#allocation3], 1 }
 0x270   :  { %705 = vsyncpa [#allocation3 + $0x1], 1 }

</bundles_post_ra>
